<compile_context>
chip_gen: v7x
topology: tpu7x:2x2x1
jax: 0.10.0
libtpu: 0.0.40
codegen_flags: <defaults>
</compile_context>

<pallas_src>
import math

import jax
import jax.numpy as jnp
from jax.experimental import pallas as pl
from jax.experimental.pallas import tpu as pltpu

_VMEM_LIMIT = 48 * 1024 * 1024   # > default scoped VMEM on v5e/v6e, < v7x 64 MiB physical


# ----------------------------------------------------------------------------
# Fused MLP kernel: one row block per grid step, weights resident in VMEM.
# ----------------------------------------------------------------------------
def _mlp_kernel(x_ref, w1_ref, b1_ref, w2_ref, b2_ref, o_ref):
    # bf16 cast inside the kernel (avoids a separate wrapper-side XLA cast op)
    x = x_ref[...].astype(jnp.bfloat16)

    # fc1: bf16 MXU matmul, f32 accumulation; bias + ReLU in f32 on the VPU
    h = jnp.dot(x, w1_ref[...], preferred_element_type=jnp.float32) + b1_ref[...]
    h = jnp.maximum(h, 0.0)
    # TODO(synk): dropout implemented as identity (inference); training-mode
    #             dropout would use pltpu.prng_seed / pltpu.prng_random_bits.

    # fc2: hidden stays in VMEM/vregs, never touches HBM
    y = jnp.dot(h.astype(jnp.bfloat16), w2_ref[...],
                preferred_element_type=jnp.float32) + b2_ref[...]
    o_ref[...] = y.astype(o_ref.dtype)


def _pick_block_m(rows, target):
    """Largest multiple-of-8 divisor of `rows` that is <= target (else rows)."""
    bm = min(target, rows)
    while bm > 8 and (rows % bm != 0 or bm % 8 != 0):
        bm -= 1
    if rows % bm != 0 or bm % 8 != 0:
        bm = rows
    return bm


def mlp_transformer_forward(x, params, *, block_m=256):
    """x: (..., in_dim) -> (..., out_d).  params = (w1, b1, w2, b2)."""
    w1, b1, w2, b2 = params
    in_dim = x.shape[-1]
    h_dim = w1.shape[1]
    out_d = w2.shape[1]
    lead = x.shape[:-1]
    rows = math.prod(lead) if lead else 1
    x2 = x.reshape(rows, in_dim)

    bm = _pick_block_m(rows, block_m)
    grid = (rows // bm,)

    out = pl.pallas_call(
        _mlp_kernel,
        out_shape=jax.ShapeDtypeStruct((rows, out_d), jnp.float32),
        grid=grid,
        in_specs=[
            pl.BlockSpec((bm, in_dim), lambda i: (i, 0)),        # row block streams
            pl.BlockSpec((in_dim, h_dim), lambda i: (0, 0)),     # weights resident
            pl.BlockSpec((1, h_dim), lambda i: (0, 0)),
            pl.BlockSpec((h_dim, out_d), lambda i: (0, 0)),
            pl.BlockSpec((1, out_d), lambda i: (0, 0)),
        ],
        out_specs=pl.BlockSpec((bm, out_d), lambda i: (i, 0)),
        compiler_params=pltpu.CompilerParams(
            dimension_semantics=("parallel",),
            vmem_limit_bytes=_VMEM_LIMIT),
    )(x2, w1, b1, w2, b2)
    return out.reshape(*lead, out_d)


# ----------------------------------------------------------------------------
# Deterministic parameter init (matches nn.Linear: U(-1/sqrt(fan_in), 1/sqrt(fan_in)),
# weights stored transposed as (in_dim, out_dim)).  Weights bf16, biases f32.
# ----------------------------------------------------------------------------
def init_params(key, in_dim, h_dim, out_d=None):
    out_d = out_d if out_d is not None else in_dim

    def uniform(k, shape, fan_in):
        bound = 1.0 / float(fan_in) ** 0.5
        return jax.random.uniform(k, shape, jnp.float32, -bound, bound)

    k1, k2, k3, k4 = jax.random.split(key, 4)
    w1 = uniform(k1, (in_dim, h_dim), in_dim).astype(jnp.bfloat16)
    b1 = uniform(k2, (1, h_dim), in_dim)
    w2 = uniform(k3, (h_dim, out_d), h_dim).astype(jnp.bfloat16)
    b2 = uniform(k4, (1, out_d), h_dim)
    return (w1, b1, w2, b2)


# ----------------------------------------------------------------------------
# Pure-JAX reference (same bf16-input / f32-accumulation policy as the kernel;
# dropout = identity).
# ----------------------------------------------------------------------------
def ref_forward(x, params):
    w1, b1, w2, b2 = params

    def mm(a, w):
        return jnp.dot(a.astype(jnp.bfloat16), w.astype(jnp.bfloat16),
                       preferred_element_type=jnp.float32)

    h = jnp.maximum(mm(x, w1) + b1, 0.0)
    return mm(h, w2) + b2


# ----------------------------------------------------------------------------
if __name__ == "__main__":
    # small, lane-dense shapes (dims multiples of 128): x is (batch, seq, in_dim)
    B, N = 4, 16
    in_dim, h_dim = 256, 512          # out_d defaults to in_dim (as in the module)

    key = jax.random.PRNGKey(0)
    kx, kp = jax.random.split(key)
    x = jax.random.normal(kx, (B, N, in_dim), jnp.float32)
    params = init_params(kp, in_dim, h_dim)

    out = mlp_transformer_forward(x, params)
    out = jax.block_until_ready(out)

    ref = ref_forward(x, params)
    assert out.shape == (B, N, in_dim), out.shape
    max_err = float(jnp.max(jnp.abs(out - ref)))
    assert jnp.allclose(out, ref, rtol=1e-2, atol=1e-2), max_err

    print("KERNEL_OK")
</pallas_src>

<mosaic_0001>
module attributes {stable_mosaic.version = 11 : i64} {
  func.func @_mlp_kernel(%arg0: i32, %arg1: memref<64x256xf32, #tpu.memory_space<vmem>>, %arg2: memref<256x512xbf16, #tpu.memory_space<vmem>>, %arg3: memref<1x512xf32, #tpu.memory_space<vmem>>, %arg4: memref<512x256xbf16, #tpu.memory_space<vmem>>, %arg5: memref<1x256xf32, #tpu.memory_space<vmem>>, %arg6: memref<64x256xf32, #tpu.memory_space<vmem>>) attributes {dimension_semantics = [#tpu.dimension_semantics<parallel>], iteration_bounds = array<i64: 1>, scalar_prefetch = 0 : i64, scratch_operands = 0 : i64, tpu.core_type = #tpu.core_type<tc>, window_params = [{transform_indices = @transform_0, window_bounds = array<i64: 64, 256>}, {pipeline_mode = #tpu.pipeline_mode<synchronous>, transform_indices = @transform_1, window_bounds = array<i64: 256, 512>}, {pipeline_mode = #tpu.pipeline_mode<synchronous>, transform_indices = @transform_2, window_bounds = array<i64: 1, 512>}, {pipeline_mode = #tpu.pipeline_mode<synchronous>, transform_indices = @transform_3, window_bounds = array<i64: 512, 256>}, {pipeline_mode = #tpu.pipeline_mode<synchronous>, transform_indices = @transform_4, window_bounds = array<i64: 1, 256>}, {transform_indices = @transform_5, window_bounds = array<i64: 64, 256>}]} {
    %c0 = arith.constant 0 : index
    %c0_0 = arith.constant 0 : index
    %0 = vector.load %arg1[%c0, %c0_0] : memref<64x256xf32, #tpu.memory_space<vmem>>, vector<64x256xf32>
    %1 = arith.truncf %0 : vector<64x256xf32> to vector<64x256xbf16>
    %c0_1 = arith.constant 0 : index
    %c0_2 = arith.constant 0 : index
    %2 = vector.load %arg2[%c0_1, %c0_2] : memref<256x512xbf16, #tpu.memory_space<vmem>>, vector<256x512xbf16>
    %cst = arith.constant dense<0.000000e+00> : vector<64x512xf32>
    %3 = tpu.matmul %1, %2, %cst {dimension_numbers = #tpu.dot_dimension_numbers<[1], [0], [0], [1], [0, 0, 1, 1], [], []>} : vector<64x256xbf16>, vector<256x512xbf16>, vector<64x512xf32> -> vector<64x512xf32>
    %c0_3 = arith.constant 0 : index
    %c0_4 = arith.constant 0 : index
    %4 = vector.load %arg3[%c0_3, %c0_4] : memref<1x512xf32, #tpu.memory_space<vmem>>, vector<1x512xf32>
    %5 = vector.broadcast %4 : vector<1x512xf32> to vector<64x512xf32>
    %6 = arith.addf %3, %5 : vector<64x512xf32>
    %cst_5 = arith.constant 0.000000e+00 : f32
    %7 = vector.broadcast %cst_5 : f32 to vector<64x512xf32>
    %8 = arith.maximumf %6, %7 : vector<64x512xf32>
    %9 = arith.truncf %8 : vector<64x512xf32> to vector<64x512xbf16>
    %c0_6 = arith.constant 0 : index
    %c0_7 = arith.constant 0 : index
    %10 = vector.load %arg4[%c0_6, %c0_7] : memref<512x256xbf16, #tpu.memory_space<vmem>>, vector<512x256xbf16>
    %cst_8 = arith.constant dense<0.000000e+00> : vector<64x256xf32>
    %11 = tpu.matmul %9, %10, %cst_8 {dimension_numbers = #tpu.dot_dimension_numbers<[1], [0], [0], [1], [0, 0, 1, 1], [], []>} : vector<64x512xbf16>, vector<512x256xbf16>, vector<64x256xf32> -> vector<64x256xf32>
    %c0_9 = arith.constant 0 : index
    %c0_10 = arith.constant 0 : index
    %12 = vector.load %arg5[%c0_9, %c0_10] : memref<1x256xf32, #tpu.memory_space<vmem>>, vector<1x256xf32>
    %13 = vector.broadcast %12 : vector<1x256xf32> to vector<64x256xf32>
    %14 = arith.addf %11, %13 : vector<64x256xf32>
    %c0_11 = arith.constant 0 : index
    %c0_12 = arith.constant 0 : index
    %15 = vector.load %arg6[%c0_11, %c0_12] : memref<64x256xf32, #tpu.memory_space<vmem>>, vector<64x256xf32>
    tpu.vector_store %arg6[%c0_11, %c0_12], %14 {strides = array<i32>} : memref<64x256xf32, #tpu.memory_space<vmem>>, vector<64x256xf32>,
    return
  }
  func.func @transform_0(%arg0: i32) -> (i32, i32) {
    %c0_i32 = arith.constant 0 : i32
    %c0_i32_0 = arith.constant 0 : i32
    return %arg0, %c0_i32 : i32, i32
  }
  func.func @transform_1(%arg0: i32) -> (i32, i32) {
    %c0_i32 = arith.constant 0 : i32
    %c0_i32_0 = arith.constant 0 : i32
    %c0_i32_1 = arith.constant 0 : i32
    return %c0_i32, %c0_i32_0 : i32, i32
  }
  func.func @transform_2(%arg0: i32) -> (i32, i32) {
    %c0_i32 = arith.constant 0 : i32
    %c0_i32_0 = arith.constant 0 : i32
    %c0_i32_1 = arith.constant 0 : i32
    return %c0_i32, %c0_i32_0 : i32, i32
  }
  func.func @transform_3(%arg0: i32) -> (i32, i32) {
    %c0_i32 = arith.constant 0 : i32
    %c0_i32_0 = arith.constant 0 : i32
    %c0_i32_1 = arith.constant 0 : i32
    return %c0_i32, %c0_i32_0 : i32, i32
  }
  func.func @transform_4(%arg0: i32) -> (i32, i32) {
    %c0_i32 = arith.constant 0 : i32
    %c0_i32_0 = arith.constant 0 : i32
    %c0_i32_1 = arith.constant 0 : i32
    return %c0_i32, %c0_i32_0 : i32, i32
  }
  func.func @transform_5(%arg0: i32) -> (i32, i32) {
    %c0_i32 = arith.constant 0 : i32
    %c0_i32_0 = arith.constant 0 : i32
    return %arg0, %c0_i32 : i32, i32
  }
}

</mosaic_0001>

<bundles_post_ra>
// kernel: tpu_custom_call.1
= control target key start
LH: loop header
LB: loop body
LE: loop exit
PB: predicated region body
PF: predicated region fallthrough
CT: control target
= control target key end

     0   :  { %10 = vsyncpa [#allocation3], 0  ;;  %s1916_s0 = inlined_call_operand.hbm [shape: f32[64,256], index: 0, kind: input, shape index: {}]   ;;  %s1917_s1 = inlined_call_operand.hbm [shape: bf16[256,512], index: 1, kind: input, shape index: {}]   ;;  %s1918_s2 = inlined_call_operand.vmem [shape: f32[1,512], index: 2, kind: input, shape index: {}]   ;;  %s1919_s3 = inlined_call_operand.hbm [shape: bf16[512,256], index: 3, kind: input, shape index: {}]   ;;  %s1920_s4 = inlined_call_operand.vmem [shape: f32[1,256], index: 4, kind: input, shape index: {}]   ;;  %s1921_s5 = inlined_call_operand.hbm [shape: f32[64,256], index: 5, kind: output, shape index: {}]  }
   0x1   :  { %11 = vsyncpa [#allocation6], 0 }
   0x2   :  { %12 = vsyncpa [#allocation4], 0  ;;  %s1716_s18 = smov [#allocation5]   ;;  %s1717_s20 = smov [#allocation2]  }
   0x3   :  { %s30_s19 = sshll.u32 %s1716_s18, 4  ;;  %s18_s21 = sshll.u32 %s1717_s20, 4  ;;  %s31_s19 = int_to_ptr.vmem [resolvable:$true] %s30_s19  ;;  %s1754_s21 = int_to_ptr.vmem [resolvable:$true] %s18_s21 }
   0x4   :  { %s1622_s24 = scalar_lea.hbm %s1917_s1, 8192 }
   0x5   :  { %p1623_p0 = scmp.ne.s32.totalorder %s1917_s1, %s1622_s24  ;;  %p1626_p1 = scmp.lt.u32.totalorder %s1622_s24, %s1917_s1 }
   0x7   :  { %p1628_p2 = pnand %p1626_p1, %p1623_p0 }
   0x9   :  { %1631 = shalt.err (!%p1628_p2)
}
   0xa   :  { %s1632_s29 = scalar_lea.vmem %s31_s19, 8192  ;;  %p1637_p4 = scmp.lt.s32.totalorder %s31_s19, %s31_s19 }
   0xb   :  { %p1633_p3 = scmp.ne.s32.totalorder %s31_s19, %s1632_s29  ;;  %p1638_p5 = scmp.lt.s32.totalorder %s1632_s29, %s1632_s29 }
   0xd   :  { %p1639_p6 = por %p1638_p5, %p1637_p4 }
   0xf   :  { %p1640_p7 = pnand %p1639_p6, %p1633_p3 }
  0x11   :  { %1643 = shalt.err (!%p1640_p7)
}
  0x12   :  { %s1718_s30 = smov 256   ;;  %s1719_s6 = smov 16  }
  0x13   :  { %36 = dma.hbm_to_vmem [thread:$0]  %s1917_s1, 8192, %s31_s19, [#allocation6], %s1718_s30, %s1718_s30, %s1719_s6  }
  0x14   :  { %s1644_s11 = scalar_lea.hbm %s1916_s0, 2048 }
  0x15   :  { %p1645_p8 = scmp.ne.s32.totalorder %s1916_s0, %s1644_s11  ;;  %p1648_p9 = scmp.lt.u32.totalorder %s1644_s11, %s1916_s0 }
  0x17   :  { %p1650_p10 = pnand %p1648_p9, %p1645_p8 }
  0x19   :  { %1653 = shalt.err (!%p1650_p10)
}
  0x1a   :  { %s1654_s16 = scalar_lea.vmem %s1754_s21, 2048  ;;  %p1659_p12 = scmp.lt.s32.totalorder %s1754_s21, %s1754_s21 }
  0x1b   :  { %p1655_p11 = scmp.ne.s32.totalorder %s1754_s21, %s1654_s16  ;;  %p1660_p13 = scmp.lt.s32.totalorder %s1654_s16, %s1654_s16 }
  0x1d   :  { %p1661_p0 = por %p1660_p13, %p1659_p12 }
  0x1f   :  { %p1662_p1 = pnand %p1661_p0, %p1655_p11 }
  0x21   :  { %1665 = shalt.err (!%p1662_p1)
}
  0x22   :  { %24 = dma.hbm_to_vmem [thread:$0]  %s1916_s0, 2048, %s1754_s21, [#allocation3], %s1718_s30, %s1718_s30, %s1719_s6  }
  0x23   :  { %s1720_s18 = smov [#allocation7]   ;;  %s1666_s23 = scalar_lea.hbm %s1919_s3, 8192 }
  0x24   :  { %s44_s19 = sshll.u32 %s1720_s18, 4  ;;  %p1667_p2 = scmp.ne.s32.totalorder %s1919_s3, %s1666_s23  ;;  %s45_s19 = int_to_ptr.vmem [resolvable:$true] %s44_s19 }
  0x25   :  { %p1670_p3 = scmp.lt.u32.totalorder %s1666_s23, %s1919_s3 }
  0x27   :  { %p1672_p4 = pnand %p1670_p3, %p1667_p2 }
  0x29   :  { %1675 = shalt.err (!%p1672_p4)
}
  0x2a   :  { %s1676_s28 = scalar_lea.vmem %s45_s19, 8192  ;;  %p1681_p6 = scmp.lt.s32.totalorder %s45_s19, %s45_s19 }
  0x2b   :  { %p1677_p5 = scmp.ne.s32.totalorder %s45_s19, %s1676_s28  ;;  %p1682_p7 = scmp.lt.s32.totalorder %s1676_s28, %s1676_s28 }
  0x2d   :  { %p1683_p8 = por %p1682_p7, %p1681_p6 }
  0x2f   :  { %p1684_p9 = pnand %p1683_p8, %p1677_p5 }
  0x31   :  { %1687 = shalt.err (!%p1684_p9)
}
  0x32   :  { %s1721_s0 = smov 128   ;;  %s1722_s21 = smov 8  }
  0x33   :  { %50 = dma.hbm_to_vmem [thread:$0]  %s1919_s3, 8192, %s45_s19, [#allocation6], %s1721_s0, %s1721_s0, %s1722_s21  }
  0x34   :  { %1710 = dma.done.wait [#allocation3], 2048  }
  0x35   :  { %1711 = vsyncadd [#allocation3], 4294965248 }
  0x36   :  { %1712 = dma.done.wait [#allocation6], 16384  }
  0x37   :  { %1713 = vsyncadd [#allocation6], 4294950912  ;;  %v1430_v0 = vld [vmem:[#allocation5 + $0x4] ss:$16 sps:$4 sm:$0xff]   ;;  %v1432_v1 = vld [vmem:[#allocation5] ss:$16 sps:$4 sm:$0xff]  }
  0x38   :  { %492 = vmatprep.subr.bf16.mxu1 %v1430_v0  ;;  %v1433_v2 = vld [vmem:[#allocation5 + $0x24] ss:$16 sps:$4 sm:$0xff]   ;;  %v1435_v3 = vld [vmem:[#allocation5 + $0x20] ss:$16 sps:$4 sm:$0xff]   ;;  %v63_v13 = vld [vmem:[#allocation2 + $0x8] sm:$0xff] }
  0x39   :  { %493 = vmatpush1.bf16.msra.mxu1 %v1432_v1  ;;  %v1436_v4 = vld [vmem:[#allocation5 + $0x44] ss:$16 sps:$4 sm:$0xff]   ;;  %v1438_v5 = vld [vmem:[#allocation5 + $0x40] ss:$16 sps:$4 sm:$0xff]   ;;  %v65_v14 = vld [vmem:[#allocation2 + $0x18] sm:$0xff] }
  0x3a   :  { %494 = vmatprep.subr.bf16.mxu1 %v1433_v2  ;;  %v1439_v6 = vld [vmem:[#allocation5 + $0x64] ss:$16 sps:$4 sm:$0xff]   ;;  %v1441_v7 = vld [vmem:[#allocation5 + $0x60] ss:$16 sps:$4 sm:$0xff]   ;;  %v1803_v15 = vpack.c.bf16 %v65_v14, %v63_v13  ;;  %v1480_v44 = vld [vmem:[#allocation5 + $0xc] ss:$16 sps:$4 sm:$0xff]  }
  0x3b   :  { %v1442_v8 = vld [vmem:[#allocation5 + $0x84] ss:$16 sps:$4 sm:$0xff]   ;;  %v1444_v9 = vld [vmem:[#allocation5 + $0x80] ss:$16 sps:$4 sm:$0xff]   ;;  %v67_v45 = vld [vmem:[#allocation2 + $0x28] sm:$0xff] }
  0x3c   :  { %v1445_v10 = vld [vmem:[#allocation5 + $0xa4] ss:$16 sps:$4 sm:$0xff]   ;;  %v1447_v11 = vld [vmem:[#allocation5 + $0xa0] ss:$16 sps:$4 sm:$0xff]   ;;  %524 = vmatprep.mubr.bf16.mxu1 %v1803_v15  ;;  %v69_v46 = vld [vmem:[#allocation2 + $0x38] sm:$0xff] }
  0x3d   :  { %495 = vmatpush1.bf16.msra.mxu1 %v1435_v3  ;;  %v1448_v12 = vld [vmem:[#allocation5 + $0xc4] ss:$16 sps:$4 sm:$0xff]   ;;  %v1450_v16 = vld [vmem:[#allocation5 + $0xc0] ss:$16 sps:$4 sm:$0xff]   ;;  %v1478_v50 = vld [vmem:[#allocation5 + $0x8] ss:$16 sps:$4 sm:$0xff]   ;;  %v1808_v52 = vpack.c.bf16 %v69_v46, %v67_v45 }
  0x3e   :  { %496 = vmatprep.subr.bf16.mxu1 %v1436_v4  ;;  %v1451_v17 = vld [vmem:[#allocation5 + $0xe4] ss:$16 sps:$4 sm:$0xff]   ;;  %v1453_v18 = vld [vmem:[#allocation5 + $0xe0] ss:$16 sps:$4 sm:$0xff]   ;;  %v1483_v51 = vld [vmem:[#allocation5 + $0x2c] ss:$16 sps:$4 sm:$0xff]  }
  0x3f   :  { %v1454_v19 = vld [vmem:[#allocation5 + $0x104] ss:$16 sps:$4 sm:$0xff]   ;;  %v1456_v20 = vld [vmem:[#allocation5 + $0x100] ss:$16 sps:$4 sm:$0xff]   ;;  %v1481_v54 = vld [vmem:[#allocation5 + $0x28] ss:$16 sps:$4 sm:$0xff]  }
  0x40   :  { %v1457_v21 = vld [vmem:[#allocation5 + $0x124] ss:$16 sps:$4 sm:$0xff]   ;;  %v1459_v22 = vld [vmem:[#allocation5 + $0x120] ss:$16 sps:$4 sm:$0xff]   ;;  %v1486_v58 = vld [vmem:[#allocation5 + $0x4c] ss:$16 sps:$4 sm:$0xff]  }
  0x41   :  { %497 = vmatpush1.bf16.msra.mxu1 %v1438_v5  ;;  %v1460_v23 = vld [vmem:[#allocation5 + $0x144] ss:$16 sps:$4 sm:$0xff]   ;;  %v1462_v24 = vld [vmem:[#allocation5 + $0x140] ss:$16 sps:$4 sm:$0xff]   ;;  %v71_v59 = vld [vmem:[#allocation2 + $0x48] sm:$0xff] }
  0x42   :  { %498 = vmatprep.subr.bf16.mxu1 %v1439_v6  ;;  %v1463_v25 = vld [vmem:[#allocation5 + $0x164] ss:$16 sps:$4 sm:$0xff]   ;;  %v1465_v26 = vld [vmem:[#allocation5 + $0x160] ss:$16 sps:$4 sm:$0xff]   ;;  %v73_v60 = vld [vmem:[#allocation2 + $0x58] sm:$0xff] }
  0x43   :  { %v1466_v27 = vld [vmem:[#allocation5 + $0x184] ss:$16 sps:$4 sm:$0xff]   ;;  %v1468_v28 = vld [vmem:[#allocation5 + $0x180] ss:$16 sps:$4 sm:$0xff]   ;;  %v1484_v63 = vld [vmem:[#allocation5 + $0x48] ss:$16 sps:$4 sm:$0xff]   ;;  %v1814_v3 = vpack.c.bf16 %v73_v60, %v71_v59 }
  0x44   :  { %v1469_v29 = vld [vmem:[#allocation5 + $0x1a4] ss:$16 sps:$4 sm:$0xff]   ;;  %v1528_v31 = vld [vmem:[#allocation7] ss:$8 sps:$4 sm:$0xff]   ;;  %v1531_v35 = vld [vmem:[#allocation7 + $0x10] ss:$8 sps:$4 sm:$0xff]  }
  0x45   :  { %499 = vmatpush1.bf16.msra.mxu1 %v1441_v7  ;;  %v1526_v30 = vld [vmem:[#allocation7 + $0x4] ss:$8 sps:$4 sm:$0xff]   ;;  %v1471_v32 = vld [vmem:[#allocation5 + $0x1a0] ss:$16 sps:$4 sm:$0xff]   ;;  %v1529_v33 = vld [vmem:[#allocation7 + $0x14] ss:$8 sps:$4 sm:$0xff]  }
  0x46   :  { %500 = vmatprep.subr.bf16.mxu1 %v1442_v8  ;;  %1082 = vmatprep.subr.bf16.mxu0 %v1526_v30  ;;  %v1472_v34 = vld [vmem:[#allocation5 + $0x1c4] ss:$16 sps:$4 sm:$0xff]   ;;  %v1474_v37 = vld [vmem:[#allocation5 + $0x1c0] ss:$16 sps:$4 sm:$0xff]   ;;  %v1489_v0 = vld [vmem:[#allocation5 + $0x6c] ss:$16 sps:$4 sm:$0xff]  }
  0x47   :  { %1083 = vmatpush1.bf16.msra.mxu0 %v1528_v31  ;;  %v1532_v36 = vld [vmem:[#allocation7 + $0x24] ss:$8 sps:$4 sm:$0xff]   ;;  %v1534_v39 = vld [vmem:[#allocation7 + $0x20] ss:$8 sps:$4 sm:$0xff]   ;;  %v1535_v40 = vld [vmem:[#allocation7 + $0x34] ss:$8 sps:$4 sm:$0xff]  }
  0x48   :  { %1084 = vmatprep.subr.bf16.mxu0 %v1529_v33  ;;  %v1475_v38 = vld [vmem:[#allocation5 + $0x1e4] ss:$16 sps:$4 sm:$0xff]   ;;  %v1477_v41 = vld [vmem:[#allocation5 + $0x1e0] ss:$16 sps:$4 sm:$0xff]   ;;  %v1487_v5 = vld [vmem:[#allocation5 + $0x68] ss:$16 sps:$4 sm:$0xff]  }
  0x49   :  { %501 = vmatpush1.bf16.msra.mxu1 %v1444_v9  ;;  %v62_v42 = vld [vmem:[#allocation2] sm:$0xff]  ;;  %v64_v43 = vld [vmem:[#allocation2 + $0x10] sm:$0xff]  ;;  %v1492_v8 = vld [vmem:[#allocation5 + $0x8c] ss:$16 sps:$4 sm:$0xff]  }
  0x4a   :  { %502 = vmatprep.subr.bf16.mxu1 %v1445_v10  ;;  %v1537_v47 = vld [vmem:[#allocation7 + $0x30] ss:$8 sps:$4 sm:$0xff]   ;;  %v1538_v48 = vld [vmem:[#allocation7 + $0x44] ss:$8 sps:$4 sm:$0xff]   ;;  %v1806_v49 = vpack.c.bf16 %v64_v43, %v62_v42  ;;  %v1540_v53 = vld [vmem:[#allocation7 + $0x40] ss:$8 sps:$4 sm:$0xff]  }
  0x4b   :  { %1085 = vmatpush1.bf16.msra.mxu0 %v1531_v35  ;;  %v66_v55 = vld [vmem:[#allocation2 + $0x20] sm:$0xff]  ;;  %v68_v56 = vld [vmem:[#allocation2 + $0x30] sm:$0xff]  ;;  %v75_v9 = vld [vmem:[#allocation2 + $0x68] sm:$0xff] }
  0x4c   :  { %1086 = vmatprep.subr.bf16.mxu0 %v1532_v36  ;;  %v1541_v57 = vld [vmem:[#allocation7 + $0x54] ss:$8 sps:$4 sm:$0xff]   ;;  %v1543_v61 = vld [vmem:[#allocation7 + $0x50] ss:$8 sps:$4 sm:$0xff]   ;;  %v1544_v62 = vld [vmem:[#allocation7 + $0x64] ss:$8 sps:$4 sm:$0xff]   ;;  %v1812_v1 = vpack.c.bf16 %v68_v56, %v66_v55 }
  0x4d   :  { %503 = vmatpush1.bf16.msra.mxu1 %v1447_v11  ;;  %v1546_v2 = vld [vmem:[#allocation7 + $0x60] ss:$8 sps:$4 sm:$0xff]   ;;  %v1547_v4 = vld [vmem:[#allocation7 + $0x74] ss:$8 sps:$4 sm:$0xff]   ;;  %v1549_v11 = vld [vmem:[#allocation7 + $0x70] ss:$8 sps:$4 sm:$0xff]  }
  0x4e   :  { %504 = vmatprep.subr.bf16.mxu1 %v1448_v12  ;;  %v70_v6 = vld [vmem:[#allocation2 + $0x40] sm:$0xff]  ;;  %v72_v7 = vld [vmem:[#allocation2 + $0x50] sm:$0xff]  ;;  %v77_v10 = vld [vmem:[#allocation2 + $0x78] sm:$0xff] }
  0x4f   :  { %1087 = vmatpush1.bf16.msra.mxu0 %v1534_v39  ;;  %v1550_v12 = vld [vmem:[#allocation7 + $0x84] ss:$8 sps:$4 sm:$0xff]   ;;  %v1818_v13 = vpack.c.bf16 %v72_v7, %v70_v6  ;;  %v1490_v14 = vld [vmem:[#allocation5 + $0x88] ss:$16 sps:$4 sm:$0xff]   ;;  %v1559_v30 = vld [vmem:[#allocation7 + $0xb4] ss:$8 sps:$4 sm:$0xff]  }
  0x50   :  { %1088 = vmatprep.subr.bf16.mxu0 %v1535_v40  ;;  %v1499_v31 = vld [vmem:[#allocation5 + $0xe8] ss:$16 sps:$4 sm:$0xff]   ;;  %v1507_v36 = vld [vmem:[#allocation5 + $0x12c] ss:$16 sps:$4 sm:$0xff]   ;;  %v1841_v60 = vld [vmem:[%s1918_s2] sm:$0xf] }
  0x51   :  { %505 = vmatpush1.bf16.msra.mxu1 %v1450_v16  ;;  %v1820_v16 = vpack.c.bf16 %v77_v10, %v75_v9  ;;  %v1561_v33 = vld [vmem:[#allocation7 + $0xb0] ss:$8 sps:$4 sm:$0xff]   ;;  %v1510_v40 = vld [vmem:[#allocation5 + $0x14c] ss:$16 sps:$4 sm:$0xff]   ;;  %v1570_v55 = vld [vmem:[#allocation7 + $0xe0] ss:$8 sps:$4 sm:$0xff]  }
  0x52   :  { %506 = vmatprep.subr.bf16.mxu1 %v1451_v17  ;;  %v1495_v17 = vld [vmem:[#allocation5 + $0xac] ss:$16 sps:$4 sm:$0xff]   ;;  %v1502_v35 = vld [vmem:[#allocation5 + $0x108] ss:$16 sps:$4 sm:$0xff]  }
  0x53   :  { %1089 = vmatpush1.bf16.msra.mxu0 %v1537_v47  ;;  %v1505_v39 = vld [vmem:[#allocation5 + $0x128] ss:$16 sps:$4 sm:$0xff]   ;;  %v1516_v43 = vld [vmem:[#allocation5 + $0x18c] ss:$16 sps:$4 sm:$0xff]  }
  0x54   :  { %1090 = vmatprep.subr.bf16.mxu0 %v1538_v48  ;;  %v1511_v42 = vld [vmem:[#allocation5 + $0x168] ss:$16 sps:$4 sm:$0xff]   ;;  %v1519_v45 = vld [vmem:[#allocation5 + $0x1ac] ss:$16 sps:$4 sm:$0xff]  }
  0x55   :  { %507 = vmatpush1.bf16.msra.mxu1 %v1453_v18  ;;  %v1552_v18 = vld [vmem:[#allocation7 + $0x80] ss:$8 sps:$4 sm:$0xff]   ;;  %v1522_v47 = vld [vmem:[#allocation5 + $0x1cc] ss:$16 sps:$4 sm:$0xff]  }
  0x56   :  { %508 = vmatprep.subr.bf16.mxu1 %v1454_v19  ;;  %v1553_v19 = vld [vmem:[#allocation7 + $0x94] ss:$8 sps:$4 sm:$0xff]   ;;  %v1517_v46 = vld [vmem:[#allocation5 + $0x1a8] ss:$16 sps:$4 sm:$0xff]  }
  0x57   :  { %1091 = vmatpush1.bf16.msra.mxu0 %v1540_v53  ;;  %v1520_v48 = vld [vmem:[#allocation5 + $0x1c8] ss:$16 sps:$4 sm:$0xff]   ;;  %v1571_v56 = vld [vmem:[#allocation7 + $0xf4] ss:$8 sps:$4 sm:$0xff]  }
  0x58   :  { %1092 = vmatprep.subr.bf16.mxu0 %v1541_v57  ;;  %v1567_v53 = vld [vmem:[#allocation7 + $0xd0] ss:$8 sps:$4 sm:$0xff]   ;;  %v152_v57 = vlaneseq }
  0x59   :  { %509 = vmatpush1.bf16.msra.mxu1 %v1456_v20  ;;  %v1493_v20 = vld [vmem:[#allocation5 + $0xa8] ss:$16 sps:$4 sm:$0xff]  }
  0x5a   :  { %510 = vmatprep.subr.bf16.mxu1 %v1457_v21  ;;  %v74_v21 = vld [vmem:[#allocation2 + $0x60] sm:$0xff] }
  0x5b   :  { %1093 = vmatpush1.bf16.msra.mxu0 %v1543_v61 }
  0x5c   :  { %1094 = vmatprep.subr.bf16.mxu0 %v1544_v62 }
  0x5d   :  { %511 = vmatpush1.bf16.msra.mxu1 %v1459_v22  ;;  %v76_v22 = vld [vmem:[#allocation2 + $0x70] sm:$0xff] }
  0x5e   :  { %512 = vmatprep.subr.bf16.mxu1 %v1460_v23  ;;  %v1498_v23 = vld [vmem:[#allocation5 + $0xcc] ss:$16 sps:$4 sm:$0xff]  }
  0x5f   :  { %1095 = vmatpush1.bf16.msra.mxu0 %v1546_v2 }
  0x60   :  { %1096 = vmatprep.subr.bf16.mxu0 %v1547_v4 }
  0x61   :  { %513 = vmatpush1.bf16.msra.mxu1 %v1462_v24  ;;  %v1555_v24 = vld [vmem:[#allocation7 + $0x90] ss:$8 sps:$4 sm:$0xff]  }
  0x62   :  { %514 = vmatprep.subr.bf16.mxu1 %v1463_v25  ;;  %v1556_v25 = vld [vmem:[#allocation7 + $0xa4] ss:$8 sps:$4 sm:$0xff]  }
  0x63   :  { %1097 = vmatpush1.bf16.msra.mxu0 %v1549_v11 }
  0x64   :  { %1098 = vmatprep.subr.bf16.mxu0 %v1550_v12 }
  0x65   :  { %515 = vmatpush1.bf16.msra.mxu1 %v1465_v26  ;;  %v1824_v26 = vpack.c.bf16 %v76_v22, %v74_v21 }
  0x66   :  { %516 = vmatprep.subr.bf16.mxu1 %v1466_v27  ;;  %v1496_v27 = vld [vmem:[#allocation5 + $0xc8] ss:$16 sps:$4 sm:$0xff]  }
  0x67   :  { %1099 = vmatpush1.bf16.msra.mxu0 %v1552_v18 }
  0x68   :  { %1100 = vmatprep.subr.bf16.mxu0 %v1553_v19 }
  0x69   :  { %517 = vmatpush1.bf16.msra.mxu1 %v1468_v28  ;;  %v1501_v28 = vld [vmem:[#allocation5 + $0xec] ss:$16 sps:$4 sm:$0xff]  }
  0x6a   :  { %518 = vmatprep.subr.bf16.mxu1 %v1469_v29  ;;  %v1558_v29 = vld [vmem:[#allocation7 + $0xa0] ss:$8 sps:$4 sm:$0xff]  }
  0x6b   :  { %1101 = vmatpush1.bf16.msra.mxu0 %v1555_v24 }
  0x6c   :  { %1102 = vmatprep.subr.bf16.mxu0 %v1556_v25  ;;  %v1577_v25 = vld [vmem:[#allocation7 + $0x110] ss:$8 sps:$4 sm:$0xff]  }
  0x6d   :  { %519 = vmatpush1.bf16.msra.mxu1 %v1471_v32  ;;  %v1504_v32 = vld [vmem:[#allocation5 + $0x10c] ss:$16 sps:$4 sm:$0xff]  }
  0x6e   :  { %520 = vmatprep.subr.bf16.mxu1 %v1472_v34  ;;  %v1562_v34 = vld [vmem:[#allocation7 + $0xc4] ss:$8 sps:$4 sm:$0xff]  }
  0x6f   :  { %1103 = vmatpush1.bf16.msra.mxu0 %v1558_v29 }
  0x70   :  { %1104 = vmatprep.subr.bf16.mxu0 %v1559_v30 }
  0x71   :  { %521 = vmatpush1.bf16.msra.mxu1 %v1474_v37  ;;  %v1564_v37 = vld [vmem:[#allocation7 + $0xc0] ss:$8 sps:$4 sm:$0xff]  }
  0x72   :  { %522 = vmatprep.subr.bf16.mxu1 %v1475_v38  ;;  %v1565_v38 = vld [vmem:[#allocation7 + $0xd4] ss:$8 sps:$4 sm:$0xff]  }
  0x73   :  { %1105 = vmatpush1.bf16.msra.mxu0 %v1561_v33 }
  0x74   :  { %1106 = vmatprep.subr.bf16.mxu0 %v1562_v34 }
  0x75   :  { %523 = vmatpush1.bf16.msra.mxu1 %v1477_v41  ;;  %v1513_v41 = vld [vmem:[#allocation5 + $0x16c] ss:$16 sps:$4 sm:$0xff]  }
  0x76   :  { %565 = vmatprep.subr.bf16.mxu1 %v1480_v44  ;;  %v1514_v44 = vld [vmem:[#allocation5 + $0x188] ss:$16 sps:$4 sm:$0xff]  }
  0x77   :  { %1107 = vmatpush1.bf16.msra.mxu0 %v1564_v37 }
  0x78   :  { %525 = vmatmul.mubr.bf16.vlgmr.msra.gmra.mrb[0].mxu1 %v1806_v49  ;;  %1108 = vmatprep.subr.bf16.mxu0 %v1565_v38 }
  0x79   :  { %566 = vmatpush1.bf16.msra.mxu1 %v1478_v50  ;;  %534 = vmatprep.mubr.bf16.mxu1 %v1808_v52  ;;  %v1525_v50 = vld [vmem:[#allocation5 + $0x1ec] ss:$16 sps:$4 sm:$0xff]  }
  0x7a   :  { %567 = vmatprep.subr.bf16.mxu1 %v1483_v51  ;;  %v1523_v51 = vld [vmem:[#allocation5 + $0x1e8] ss:$16 sps:$4 sm:$0xff]  }
  0x7b   :  { %1109 = vmatpush1.bf16.msra.mxu0 %v1567_v53 }
  0x7d   :  { %568 = vmatpush1.bf16.msra.mxu1 %v1481_v54  ;;  %v1568_v54 = vld [vmem:[#allocation7 + $0xe4] ss:$8 sps:$4 sm:$0xff]  }
  0x7e   :  { %569 = vmatprep.subr.bf16.mxu1 %v1486_v58  ;;  %1110 = vmatprep.subr.bf16.mxu0 %v1568_v54  ;;  %v1835_v58 = vshrl.u32 %v152_v57, 7  ;;  %v1591_v54 = vld [vmem:[#allocation7 + $0x154] ss:$8 sps:$4 sm:$0xff]  }
  0x7f   :  { %1111 = vmatpush1.bf16.msra.mxu0 %v1570_v55 }
  0x80   :  { %535 = vmatmul.mubr.bf16.gmra.mrb[4].mxu1 %v1812_v1  ;;  %1112 = vmatprep.subr.bf16.mxu0 %v1571_v56  ;;  %v154_v59 = vsub.s32 0, %v1835_v58  ;;  %v158_v61 = vsub.s32 1, %v1835_v58 }
  0x81   :  { %570 = vmatpush1.bf16.msra.mxu1 %v1484_v63  ;;  %544 = vmatprep.mubr.bf16.mxu1 %v1814_v3 }
  0x82   :  { %571 = vmatprep.subr.bf16.mxu1 %v1489_v0  ;;  %v1847_v62 = vrot.slane %v1841_v60, %v154_v59  ;;  %v1852_v63 = vrot.slane %v1841_v60, %v158_v61 }
  0x85   :  { %572 = vmatpush1.bf16.msra.mxu1 %v1487_v5 }
  0x86   :  { %573 = vmatprep.subr.bf16.mxu1 %v1492_v8 }
  0x88   :  { %545 = vmatmul.mubr.bf16.gmra.mrb[8].mxu1 %v1818_v13 }
  0x89   :  { %574 = vmatpush1.bf16.msra.mxu1 %v1490_v14  ;;  %554 = vmatprep.mubr.bf16.mxu1 %v1820_v16  ;;  %v1574_v14 = vld [vmem:[#allocation7 + $0x100] ss:$8 sps:$4 sm:$0xff]  }
  0x8a   :  { %575 = vmatprep.subr.bf16.mxu1 %v1495_v17  ;;  %v1579_v17 = vld [vmem:[#allocation7 + $0x114] ss:$8 sps:$4 sm:$0xff]  }
  0x8d   :  { %576 = vmatpush1.bf16.msra.mxu1 %v1493_v20 }
  0x8e   :  { %577 = vmatprep.subr.bf16.mxu1 %v1498_v23 }
  0x90   :  { %555 = vmatmul.mubr.bf16.gmra.mrb[12].mxu1 %v1824_v26 }
  0x91   :  { %578 = vmatpush1.bf16.msra.mxu1 %v1496_v27  ;;  %597 = vmatprep.mubr.bf16.mxu1 %v1803_v15  ;;  %v1508_v15 = vld [vmem:[#allocation5 + $0x148] ss:$16 sps:$4 sm:$0xff]  }
  0x92   :  { %579 = vmatprep.subr.bf16.mxu1 %v1501_v28  ;;  %v1582_v28 = vld [vmem:[#allocation7 + $0x124] ss:$8 sps:$4 sm:$0xff]  }
  0x95   :  { %580 = vmatpush1.bf16.msra.mxu1 %v1499_v31 }
  0x96   :  { %581 = vmatprep.subr.bf16.mxu1 %v1504_v32  ;;  %v1580_v32 = vld [vmem:[#allocation7 + $0x120] ss:$8 sps:$4 sm:$0xff]  }
  0x99   :  { %582 = vmatpush1.bf16.msra.mxu1 %v1502_v35  ;;  %v1585_v35 = vld [vmem:[#allocation7 + $0x134] ss:$8 sps:$4 sm:$0xff]  }
  0x9a   :  { %583 = vmatprep.subr.bf16.mxu1 %v1507_v36 }
  0x9d   :  { %584 = vmatpush1.bf16.msra.mxu1 %v1505_v39 }
  0x9e   :  { %585 = vmatprep.subr.bf16.mxu1 %v1510_v40 }
  0xa1   :  { %586 = vmatpush1.bf16.msra.mxu1 %v1508_v15 }
  0xa2   :  { %587 = vmatprep.subr.bf16.mxu1 %v1513_v41 }
  0xa5   :  { %588 = vmatpush1.bf16.msra.mxu1 %v1511_v42  ;;  %v1583_v42 = vld [vmem:[#allocation7 + $0x130] ss:$8 sps:$4 sm:$0xff]  }
  0xa6   :  { %589 = vmatprep.subr.bf16.mxu1 %v1516_v43 }
  0xa9   :  { %590 = vmatpush1.bf16.msra.mxu1 %v1514_v44 }
  0xaa   :  { %591 = vmatprep.subr.bf16.mxu1 %v1519_v45  ;;  %v1588_v45 = vld [vmem:[#allocation7 + $0x144] ss:$8 sps:$4 sm:$0xff]  }
  0xad   :  { %592 = vmatpush1.bf16.msra.mxu1 %v1517_v46 }
  0xae   :  { %593 = vmatprep.subr.bf16.mxu1 %v1522_v47 }
  0xb1   :  { %594 = vmatpush1.bf16.msra.mxu1 %v1520_v48 }
  0xb2   :  { %595 = vmatprep.subr.bf16.mxu1 %v1525_v50  ;;  %v1586_v50 = vld [vmem:[#allocation7 + $0x140] ss:$8 sps:$4 sm:$0xff]  }
  0xb5   :  { %596 = vmatpush1.bf16.msra.mxu1 %v1523_v51 }
  0xb8   :  { %598 = vmatmul.mubr.bf16.vlgmr.msra.gmra.mrb[16].mxu1 %v1806_v49  ;;  %v1573_v49 = vld [vmem:[#allocation7 + $0xf0] ss:$8 sps:$4 sm:$0xff]  }
  0xb9   :  { %607 = vmatprep.mubr.bf16.mxu1 %v1808_v52  ;;  %1113 = vmatpush1.bf16.msra.mxu0 %v1573_v49  ;;  %v1576_v52 = vld [vmem:[#allocation7 + $0x104] ss:$8 sps:$4 sm:$0xff]  }
  0xba   :  { %1155 = vmatprep.subr.bf16.mxu0 %v1576_v52 }
  0xc0   :  { %608 = vmatmul.mubr.bf16.gmra.mrb[20].mxu1 %v1812_v1 }
  0xc1   :  { %617 = vmatprep.mubr.bf16.mxu1 %v1814_v3 }
  0xc8   :  { %618 = vmatmul.mubr.bf16.gmra.mrb[24].mxu1 %v1818_v13 }
  0xc9   :  { %627 = vmatprep.mubr.bf16.mxu1 %v1820_v16 }
  0xd0   :  { %628 = vmatmul.mubr.bf16.gmra.mrb[28].mxu1 %v1824_v26 }
 0x14b   :  { %v526_v0 = vpop.f32.mrb[0].mxu1 }
 0x14c   :  { %v527_v1 = vadd.f32 %v526_v0, %v1847_v62  ;;  %v528_v2 = vpop.f32.mrb[1].mxu1 }
 0x14d   :  { %v529_v3 = vadd.f32 %v528_v2, %v1852_v63  ;;  %v530_v4 = vpop.f32.mrb[2].mxu1  ;;  %v1589_v2 = vld [vmem:[#allocation7 + $0x150] ss:$8 sps:$4 sm:$0xff]  }
 0x14e   :  { %v638_v5 = vmax.f32 %v527_v1, 0.0  ;;  %v531_v6 = vadd.f32 %v530_v4, %v1847_v62  ;;  %v532_v7 = vpop.f32.mrb[3].mxu1 }
 0x14f   :  { %v533_v8 = vadd.f32 %v532_v7, %v1852_v63  ;;  %v639_v10 = vmax.f32 %v529_v3, 0.0 }
 0x150   :  { %v642_v9 = vmax.f32 %v531_v6, 0.0 }
 0x151   :  { %v643_v11 = vmax.f32 %v533_v8, 0.0 }
 0x152   :  { %v670_v12 = vpack.c.bf16 %v642_v9, %v638_v5  ;;  %v1594_v5 = vld [vmem:[#allocation7 + $0x164] ss:$8 sps:$4 sm:$0xff]   ;;  %v1592_v9 = vld [vmem:[#allocation7 + $0x160] ss:$8 sps:$4 sm:$0xff]  }
 0x153   :  { %v671_v13 = vpack.c.bf16 %v643_v11, %v639_v10  ;;  %v536_v16 = vpop.f32.mrb[4].mxu1  ;;  %v1597_v11 = vld [vmem:[#allocation7 + $0x174] ss:$8 sps:$4 sm:$0xff]  }
 0x154   :  { %v537_v18 = vadd.f32 %v536_v16, %v1847_v62  ;;  %v538_v19 = vpop.f32.mrb[5].mxu1  ;;  %v1606_v16 = vld [vmem:[#allocation7 + $0x1a4] ss:$8 sps:$4 sm:$0xff]  }
 0x155   :  { %1114 = vmatprep.mubr.bf16.mxu0 %v671_v13  ;;  %v539_v20 = vadd.f32 %v538_v19, %v1852_v63  ;;  %v540_v21 = vpop.f32.mrb[6].mxu1  ;;  %v1598_v13 = vld [vmem:[#allocation7 + $0x180] ss:$8 sps:$4 sm:$0xff]   ;;  %v1607_v19 = vld [vmem:[#allocation7 + $0x1b0] ss:$8 sps:$4 sm:$0xff]  }
 0x156   :  { %1115 = vmatmul.mubr.bf16.vlgmr.msra.gmra.mrb[0].mxu0 %v670_v12  ;;  %v646_v22 = vmax.f32 %v537_v18, 0.0  ;;  %v541_v23 = vadd.f32 %v540_v21, %v1847_v62  ;;  %v542_v24 = vpop.f32.mrb[7].mxu1  ;;  %v1600_v12 = vld [vmem:[#allocation7 + $0x184] ss:$8 sps:$4 sm:$0xff]   ;;  %v1609_v18 = vld [vmem:[#allocation7 + $0x1b4] ss:$8 sps:$4 sm:$0xff]  }
 0x157   :  { %1156 = vmatpush1.bf16.msra.mxu0 %v1574_v14  ;;  %v647_v26 = vmax.f32 %v539_v20, 0.0  ;;  %v543_v27 = vadd.f32 %v542_v24, %v1852_v63  ;;  %v1601_v14 = vld [vmem:[#allocation7 + $0x190] ss:$8 sps:$4 sm:$0xff]   ;;  %v1612_v20 = vld [vmem:[#allocation7 + $0x1c4] ss:$8 sps:$4 sm:$0xff]   ;;  %v166_v24 = vsub.s32 3, %v1835_v58 }
 0x158   :  { %1157 = vmatprep.subr.bf16.mxu0 %v1579_v17  ;;  %v650_v29 = vmax.f32 %v541_v23, 0.0  ;;  %v1604_v17 = vld [vmem:[#allocation7 + $0x1a0] ss:$8 sps:$4 sm:$0xff]   ;;  %v162_v23 = vsub.s32 2, %v1835_v58 }
 0x159   :  { %v651_v30 = vmax.f32 %v543_v27, 0.0  ;;  %v1610_v21 = vld [vmem:[#allocation7 + $0x1c0] ss:$8 sps:$4 sm:$0xff]   ;;  %v1618_v27 = vld [vmem:[#allocation7 + $0x1e4] ss:$8 sps:$4 sm:$0xff]  }
 0x15a   :  { %v674_v31 = vpack.c.bf16 %v650_v29, %v646_v22  ;;  %v1615_v22 = vld [vmem:[#allocation7 + $0x1d4] ss:$8 sps:$4 sm:$0xff]  }
 0x15b   :  { %1158 = vmatpush1.bf16.msra.mxu0 %v1577_v25  ;;  %v675_v33 = vpack.c.bf16 %v651_v30, %v647_v26  ;;  %v546_v34 = vpop.f32.mrb[8].mxu1  ;;  %v1613_v25 = vld [vmem:[#allocation7 + $0x1d0] ss:$8 sps:$4 sm:$0xff]   ;;  %v1873_v26 = vrot.slane %v1841_v60, %v162_v23  ;;  %v1616_v30 = vld [vmem:[#allocation7 + $0x1e0] ss:$8 sps:$4 sm:$0xff]  }
 0x15c   :  { %1159 = vmatprep.subr.bf16.mxu0 %v1582_v28  ;;  %v547_v36 = vadd.f32 %v546_v34, %v1847_v62  ;;  %v548_v37 = vpop.f32.mrb[9].mxu1  ;;  %v1876_v28 = vrot.slane %v1841_v60, %v166_v24 }
 0x15d   :  { %v549_v38 = vadd.f32 %v548_v37, %v1852_v63  ;;  %v550_v39 = vpop.f32.mrb[10].mxu1  ;;  %1124 = vmatprep.mubr.bf16.mxu0 %v675_v33  ;;  %v1621_v33 = vld [vmem:[#allocation7 + $0x1f4] ss:$8 sps:$4 sm:$0xff]  }
 0x15e   :  { %v654_v40 = vmax.f32 %v547_v36, 0.0  ;;  %v551_v15 = vadd.f32 %v550_v39, %v1847_v62  ;;  %v552_v41 = vpop.f32.mrb[11].mxu1  ;;  %1125 = vmatmul.mubr.bf16.gmra.mrb[4].mxu0 %v674_v31  ;;  %v1619_v39 = vld [vmem:[#allocation7 + $0x1f0] ss:$8 sps:$4 sm:$0xff]  }
 0x15f   :  { %1160 = vmatpush1.bf16.msra.mxu0 %v1580_v32  ;;  %v655_v43 = vmax.f32 %v549_v38, 0.0  ;;  %v553_v44 = vadd.f32 %v552_v41, %v1852_v63 }
 0x160   :  { %1161 = vmatprep.subr.bf16.mxu0 %v1585_v35  ;;  %v658_v46 = vmax.f32 %v551_v15, 0.0 }
 0x161   :  { %v659_v47 = vmax.f32 %v553_v44, 0.0 }
 0x162   :  { %v678_v48 = vpack.c.bf16 %v658_v46, %v654_v40 }
 0x163   :  { %1162 = vmatpush1.bf16.msra.mxu0 %v1583_v42  ;;  %v679_v51 = vpack.c.bf16 %v659_v47, %v655_v43  ;;  %v556_v53 = vpop.f32.mrb[12].mxu1 }
 0x164   :  { %1163 = vmatprep.subr.bf16.mxu0 %v1588_v45  ;;  %v557_v55 = vadd.f32 %v556_v53, %v1847_v62  ;;  %v558_v56 = vpop.f32.mrb[13].mxu1 }
 0x165   :  { %v559_v49 = vadd.f32 %v558_v56, %v1852_v63  ;;  %v560_v52 = vpop.f32.mrb[14].mxu1  ;;  %1134 = vmatprep.mubr.bf16.mxu0 %v679_v51 }
 0x166   :  { %v662_v57 = vmax.f32 %v557_v55, 0.0  ;;  %v561_v0 = vadd.f32 %v560_v52, %v1847_v62  ;;  %v562_v1 = vpop.f32.mrb[15].mxu1  ;;  %1135 = vmatmul.mubr.bf16.gmra.mrb[8].mxu0 %v678_v48  ;;  %v1595_v62 = vld [vmem:[#allocation7 + $0x170] ss:$8 sps:$4 sm:$0xff]  }
 0x167   :  { %1164 = vmatpush1.bf16.msra.mxu0 %v1586_v50  ;;  %v663_v3 = vmax.f32 %v559_v49, 0.0  ;;  %v563_v4 = vadd.f32 %v562_v1, %v1852_v63  ;;  %v1603_v63 = vld [vmem:[#allocation7 + $0x194] ss:$8 sps:$4 sm:$0xff]  }
 0x168   :  { %1165 = vmatprep.subr.bf16.mxu0 %v1591_v54  ;;  %v666_v6 = vmax.f32 %v561_v0, 0.0 }
 0x169   :  { %v667_v7 = vmax.f32 %v563_v4, 0.0 }
 0x16a   :  { %v682_v8 = vpack.c.bf16 %v666_v6, %v662_v57 }
 0x16b   :  { %1166 = vmatpush1.bf16.msra.mxu0 %v1589_v2  ;;  %v683_v10 = vpack.c.bf16 %v667_v7, %v663_v3 }
 0x16c   :  { %1167 = vmatprep.subr.bf16.mxu0 %v1594_v5 }
 0x16d   :  { %1144 = vmatprep.mubr.bf16.mxu0 %v683_v10 }
 0x16e   :  { %1145 = vmatmul.mubr.bf16.gmra.mrb[12].mxu0 %v682_v8 }
 0x16f   :  { %1168 = vmatpush1.bf16.msra.mxu0 %v1592_v9 }
 0x170   :  { %1169 = vmatprep.subr.bf16.mxu0 %v1597_v11 }
 0x173   :  { %1170 = vmatpush1.bf16.msra.mxu0 %v1595_v62 }
 0x174   :  { %1171 = vmatprep.subr.bf16.mxu0 %v1600_v12 }
 0x177   :  { %1172 = vmatpush1.bf16.msra.mxu0 %v1598_v13 }
 0x178   :  { %1173 = vmatprep.subr.bf16.mxu0 %v1603_v63 }
 0x17b   :  { %1174 = vmatpush1.bf16.msra.mxu0 %v1601_v14 }
 0x17c   :  { %1175 = vmatprep.subr.bf16.mxu0 %v1606_v16 }
 0x17f   :  { %1176 = vmatpush1.bf16.msra.mxu0 %v1604_v17 }
 0x180   :  { %1177 = vmatprep.subr.bf16.mxu0 %v1609_v18 }
 0x183   :  { %1178 = vmatpush1.bf16.msra.mxu0 %v1607_v19 }
 0x184   :  { %1179 = vmatprep.subr.bf16.mxu0 %v1612_v20 }
 0x187   :  { %1180 = vmatpush1.bf16.msra.mxu0 %v1610_v21 }
 0x188   :  { %1181 = vmatprep.subr.bf16.mxu0 %v1615_v22 }
 0x18b   :  { %v599_v29 = vpop.f32.mrb[16].mxu1  ;;  %1182 = vmatpush1.bf16.msra.mxu0 %v1613_v25 }
 0x18c   :  { %v600_v31 = vadd.f32 %v599_v29, %v1873_v26  ;;  %v601_v32 = vpop.f32.mrb[17].mxu1  ;;  %1183 = vmatprep.subr.bf16.mxu0 %v1618_v27  ;;  %v750_v29 = vld [vmem:[%s1920_s4] sm:$0x3]  ;;  %s1723_s4 = smov [#allocation8]  }
 0x18d   :  { %v602_v34 = vadd.f32 %v601_v32, %v1876_v28  ;;  %v603_v35 = vpop.f32.mrb[18].mxu1  ;;  %s1249_s10 = sshll.u32 %s1723_s4, 4  ;;  %s1250_s10 = int_to_ptr.vmem [resolvable:$true] %s1249_s10 }
 0x18e   :  { %v604_v36 = vadd.f32 %v603_v35, %v1873_v26  ;;  %v605_v37 = vpop.f32.mrb[19].mxu1  ;;  %v640_v60 = vmax.f32 %v600_v31, 0.0  ;;  %s1688_s11 = scalar_lea.vmem %s1250_s10, 2048  ;;  %p1693_p11 = scmp.lt.s32.totalorder %s1250_s10, %s1250_s10 }
 0x18f   :  { %v606_v38 = vadd.f32 %v605_v37, %v1876_v28  ;;  %1184 = vmatpush1.bf16.msra.mxu0 %v1616_v30  ;;  %v641_v15 = vmax.f32 %v602_v34, 0.0  ;;  %v755_v30 = vrot.slane %v750_v29, %v154_v59  ;;  %p1689_p10 = scmp.ne.s32.totalorder %s1250_s10, %s1688_s11  ;;  %p1694_p12 = scmp.lt.s32.totalorder %s1688_s11, %s1688_s11 }
 0x190   :  { %v644_v40 = vmax.f32 %v604_v36, 0.0  ;;  %1185 = vmatprep.subr.bf16.mxu0 %v1621_v33 }
 0x191   :  { %v645_v41 = vmax.f32 %v606_v38, 0.0  ;;  %p1695_p13 = por %p1694_p12, %p1693_p11 }
 0x192   :  { %v672_v42 = vpack.c.bf16 %v644_v40, %v640_v60 }
 0x193   :  { %v673_v43 = vpack.c.bf16 %v645_v41, %v641_v15  ;;  %v609_v44 = vpop.f32.mrb[20].mxu1  ;;  %1186 = vmatpush1.bf16.msra.mxu0 %v1619_v39  ;;  %p1696_p0 = pnand %p1695_p13, %p1689_p10 }
 0x194   :  { %v610_v45 = vadd.f32 %v609_v44, %v1873_v26  ;;  %v611_v46 = vpop.f32.mrb[21].mxu1 }
 0x195   :  { %v612_v47 = vadd.f32 %v611_v46, %v1876_v28  ;;  %v613_v48 = vpop.f32.mrb[22].mxu1  ;;  %1187 = vmatprep.mubr.bf16.mxu0 %v673_v43 }
 0x196   :  { %v614_v50 = vadd.f32 %v613_v48, %v1873_v26  ;;  %v615_v51 = vpop.f32.mrb[23].mxu1  ;;  %1188 = vmatmul.mubr.bf16.vlgmr.msra.gmra.mrb[0].mxu0 %v672_v42  ;;  %v648_v54 = vmax.f32 %v610_v45, 0.0 }
 0x197   :  { %v616_v53 = vadd.f32 %v615_v51, %v1876_v28  ;;  %v649_v56 = vmax.f32 %v612_v47, 0.0 }
 0x198   :  { %v652_v55 = vmax.f32 %v614_v50, 0.0 }
 0x199   :  { %v653_v49 = vmax.f32 %v616_v53, 0.0 }
 0x19a   :  { %v676_v52 = vpack.c.bf16 %v652_v55, %v648_v54 }
 0x19b   :  { %v677_v57 = vpack.c.bf16 %v653_v49, %v649_v56  ;;  %v619_v0 = vpop.f32.mrb[24].mxu1 }
 0x19c   :  { %v620_v1 = vadd.f32 %v619_v0, %v1873_v26  ;;  %v621_v2 = vpop.f32.mrb[25].mxu1 }
 0x19d   :  { %v622_v3 = vadd.f32 %v621_v2, %v1876_v28  ;;  %v623_v4 = vpop.f32.mrb[26].mxu1  ;;  %1197 = vmatprep.mubr.bf16.mxu0 %v677_v57 }
 0x19e   :  { %v624_v5 = vadd.f32 %v623_v4, %v1873_v26  ;;  %v625_v6 = vpop.f32.mrb[27].mxu1  ;;  %1198 = vmatmul.mubr.bf16.gmra.mrb[4].mxu0 %v676_v52  ;;  %v656_v8 = vmax.f32 %v620_v1, 0.0 }
 0x19f   :  { %v626_v7 = vadd.f32 %v625_v6, %v1876_v28  ;;  %v657_v10 = vmax.f32 %v622_v3, 0.0 }
 0x1a0   :  { %v660_v9 = vmax.f32 %v624_v5, 0.0 }
 0x1a1   :  { %v661_v11 = vmax.f32 %v626_v7, 0.0 }
 0x1a2   :  { %v680_v62 = vpack.c.bf16 %v660_v9, %v656_v8 }
 0x1a3   :  { %v681_v12 = vpack.c.bf16 %v661_v11, %v657_v10  ;;  %v629_v13 = vpop.f32.mrb[28].mxu1 }
 0x1a4   :  { %v630_v63 = vadd.f32 %v629_v13, %v1873_v26  ;;  %v631_v14 = vpop.f32.mrb[29].mxu1 }
 0x1a5   :  { %v632_v16 = vadd.f32 %v631_v14, %v1876_v28  ;;  %v633_v17 = vpop.f32.mrb[30].mxu1  ;;  %1207 = vmatprep.mubr.bf16.mxu0 %v681_v12 }
 0x1a6   :  { %v634_v18 = vadd.f32 %v633_v17, %v1873_v26  ;;  %v635_v19 = vpop.f32.mrb[31].mxu1  ;;  %1208 = vmatmul.mubr.bf16.gmra.mrb[8].mxu0 %v680_v62  ;;  %v664_v21 = vmax.f32 %v630_v63, 0.0  ;;  %v759_v26 = vrot.slane %v750_v29, %v158_v61 }
 0x1a7   :  { %v636_v20 = vadd.f32 %v635_v19, %v1876_v28  ;;  %v665_v23 = vmax.f32 %v632_v16, 0.0 }
 0x1a8   :  { %v668_v22 = vmax.f32 %v634_v18, 0.0 }
 0x1a9   :  { %v669_v24 = vmax.f32 %v636_v20, 0.0 }
 0x1aa   :  { %v684_v25 = vpack.c.bf16 %v668_v22, %v664_v21 }
 0x1ab   :  { %v685_v27 = vpack.c.bf16 %v669_v24, %v665_v23 }
 0x1ad   :  { %1217 = vmatprep.mubr.bf16.mxu0 %v685_v27 }
 0x1ae   :  { %1218 = vmatmul.mubr.bf16.gmra.mrb[12].mxu0 %v684_v25 }
 0x269   :  { %v1189_v31 = vpop.f32.mrb[0].mxu0 }
 0x26a   :  { %v1390_v28 = vadd.f32 %v1189_v31, %v755_v30  ;;  %v1191_v32 = vpop.f32.mrb[1].mxu0 }
 0x26b   :  { %v1391_v33 = vadd.f32 %v1191_v32, %v759_v26  ;;  %v1193_v34 = vpop.f32.mrb[2].mxu0 }
 0x26c   :  { %1228 = vst [vmem:[#allocation8] sm:$0xff] %v1390_v28  ;;  %v1392_v35 = vadd.f32 %v1193_v34, %v755_v30  ;;  %v1195_v36 = vpop.f32.mrb[3].mxu0 }
 0x26d   :  { %1229 = vst [vmem:[#allocation8 + $0x8] sm:$0xff] %v1391_v33  ;;  %v1393_v37 = vadd.f32 %v1195_v36, %v759_v26 }
 0x26e   :  { %1230 = vst [vmem:[#allocation8 + $0x10] sm:$0xff] %v1392_v35 }
 0x26f   :  { %1231 = vst [vmem:[#allocation8 + $0x18] sm:$0xff] %v1393_v37 }
 0x271   :  { %v1199_v38 = vpop.f32.mrb[4].mxu0 }
 0x272   :  { %v1394_v39 = vadd.f32 %v1199_v38, %v755_v30  ;;  %v1201_v60 = vpop.f32.mrb[5].mxu0 }
 0x273   :  { %v1395_v40 = vadd.f32 %v1201_v60, %v759_v26  ;;  %v1203_v59 = vpop.f32.mrb[6].mxu0 }
 0x274   :  { %1232 = vst [vmem:[#allocation8 + $0x20] sm:$0xff] %v1394_v39  ;;  %v1396_v58 = vadd.f32 %v1203_v59, %v755_v30  ;;  %v1205_v61 = vpop.f32.mrb[7].mxu0 }
 0x275   :  { %1233 = vst [vmem:[#allocation8 + $0x28] sm:$0xff] %v1395_v40  ;;  %v1397_v15 = vadd.f32 %v1205_v61, %v759_v26 }
 0x276   :  { %1234 = vst [vmem:[#allocation8 + $0x30] sm:$0xff] %v1396_v58 }
 0x277   :  { %1235 = vst [vmem:[#allocation8 + $0x38] sm:$0xff] %v1397_v15 }
 0x279   :  { %v1209_v41 = vpop.f32.mrb[8].mxu0 }
 0x27a   :  { %v1398_v42 = vadd.f32 %v1209_v41, %v755_v30  ;;  %v1211_v43 = vpop.f32.mrb[9].mxu0 }
 0x27b   :  { %v1399_v44 = vadd.f32 %v1211_v43, %v759_v26  ;;  %v1213_v45 = vpop.f32.mrb[10].mxu0 }
 0x27c   :  { %1236 = vst [vmem:[#allocation8 + $0x40] sm:$0xff] %v1398_v42  ;;  %v1400_v46 = vadd.f32 %v1213_v45, %v755_v30  ;;  %v1215_v47 = vpop.f32.mrb[11].mxu0 }
 0x27d   :  { %1237 = vst [vmem:[#allocation8 + $0x48] sm:$0xff] %v1399_v44  ;;  %v1401_v48 = vadd.f32 %v1215_v47, %v759_v26 }
 0x27e   :  { %1238 = vst [vmem:[#allocation8 + $0x50] sm:$0xff] %v1400_v46 }
 0x27f   :  { %1239 = vst [vmem:[#allocation8 + $0x58] sm:$0xff] %v1401_v48 }
 0x281   :  { %v1219_v50 = vpop.f32.mrb[12].mxu0 }
 0x282   :  { %v1402_v51 = vadd.f32 %v1219_v50, %v755_v30  ;;  %v1221_v53 = vpop.f32.mrb[13].mxu0 }
 0x283   :  { %v1403_v54 = vadd.f32 %v1221_v53, %v759_v26  ;;  %v1223_v55 = vpop.f32.mrb[14].mxu0 }
 0x284   :  { %1240 = vst [vmem:[#allocation8 + $0x60] sm:$0xff] %v1402_v51  ;;  %v1404_v56 = vadd.f32 %v1223_v55, %v755_v30  ;;  %v1225_v49 = vpop.f32.mrb[15].mxu0 }
 0x285   :  { %1241 = vst [vmem:[#allocation8 + $0x68] sm:$0xff] %v1403_v54  ;;  %v1405_v52 = vadd.f32 %v1225_v49, %v759_v26 }
 0x286   :  { %1242 = vst [vmem:[#allocation8 + $0x70] sm:$0xff] %v1404_v56 }
 0x287   :  { %1243 = vst [vmem:[#allocation8 + $0x78] sm:$0xff] %v1405_v52 }
 0x288   :  { %1699 = shalt.err (!%p1696_p0)
}
 0x289   :  { %s1700_s14 = scalar_lea.hbm %s1921_s5, 2048 }
 0x28a   :  { %p1701_p1 = scmp.ne.s32.totalorder %s1921_s5, %s1700_s14  ;;  %p1704_p2 = scmp.lt.u32.totalorder %s1700_s14, %s1921_s5 }
 0x28c   :  { %p1706_p3 = pnand %p1704_p2, %p1701_p1 }
 0x28e   :  { %1709 = shalt.err (!%p1706_p3)
}
 0x28f   :  { %1255 = dma.vmem_to_hbm [thread:$0]  %s1250_s10, 2048, %s1921_s5, [#allocation4], %s1718_s30, %s1718_s30, %s1719_s6  }
 0x290   :  { %1714 = dma.done.wait [#allocation4], 2048  }
 0x291   :  { %1715 = vsyncadd [#allocation4], 4294965248 }
 0x292   :  { %1259 = vsyncpa [#allocation3], 1 }
 0x293   :  { %1260 = vsyncpa [#allocation6], 1 }
 0x294   :  { %1261 = vsyncpa [#allocation4], 1 }

</bundles_post_ra>
